<compile_context>
chip_gen: v6e
topology: v6e:2x2x1
jax: 0.10.0
libtpu: 0.0.40
codegen_flags: <defaults>
</compile_context>

<pallas_src>
import functools

import jax
import jax.numpy as jnp
from jax.experimental import pallas as pl
from jax.experimental.pallas import tpu as pltpu


def _round_up(x, m):
    return (x + m - 1) // m * m


def _conv1d_q_kernel(x_ref, w_ref, b_ref, o_ref, *, scale, out_zp, int8_path):
    """matmul (MXU) -> fused requantize -> uint8 store.

    x_ref: (tm, Kp)  int8 (x_raw - 128) on the int8 path, else uint8 raw quant values
    w_ref: (Kp, tn)  int8 raw quant weights (weight zero_point == 0)
    b_ref: (1, tn)   f32 fused bias: (bias + s_x*s_w*(c - x_zp)*colsum(w)) / s_out
    o_ref: (tm, tn)  uint8 quantized output
    """
    if int8_path:
        # Exact int32 accumulation on the int MXU (v5e/v6e).
        acc = jnp.dot(x_ref[...], w_ref[...],
                      preferred_element_type=jnp.int32).astype(jnp.float32)
    else:
        # 8-bit values are exactly representable in bf16; f32 accumulation.
        # TODO(synk): f32 accumulation is only integer-exact up to 2^24; for very
        # large C_in*K prefer the int8 path.
        acc = jnp.dot(x_ref[...].astype(jnp.bfloat16),
                      w_ref[...].astype(jnp.bfloat16),
                      preferred_element_type=jnp.float32)
    # One FMA + round + clip: requant scale and all bias/zero-point terms prefused.
    q = jnp.round(acc * scale + b_ref[...]) + out_zp
    o_ref[...] = jnp.clip(q, 0.0, 255.0).astype(jnp.uint8)


def quantized_conv1d(x_q, x_scale, x_zp, w_q, w_scale, bias,
                     out_scale, out_zp, *, stride=1, padding=0, dilation=1,
                     groups=1, tm_max=256, tn_max=256):
    """Matches torch.ops.quantized.conv1d for groups=1, zeros padding_mode."""
    assert groups == 1  # TODO(synk): grouped quantized conv not implemented
    N, C_in, L = x_q.shape
    C_out, _, K = w_q.shape
    L_out = (L + 2 * padding - dilation * (K - 1) - 1) // stride + 1

    # int MXU on v5e/v6e; bf16 everywhere else (v7x MXU has no int path).
    kind = jax.devices()[0].device_kind.lower()
    int8_path = ("v5" in kind) or ("v6" in kind)

    # Zero padding in float domain == padding with the input zero_point in quant domain.
    xp = jnp.pad(x_q, ((0, 0), (0, 0), (padding, padding)),
                 constant_values=jnp.uint8(x_zp))

    # im2col, kept 8-bit: (N*L_out, C_in*K) of raw quant values.
    taps = [xp[:, :, k * dilation: k * dilation + (L_out - 1) * stride + 1: stride]
            for k in range(K)]                                  # each (N, C_in, L_out)
    patches = jnp.stack(taps, axis=-1).transpose(0, 2, 1, 3)    # (N, L_out, C_in, K)
    patches = patches.reshape(N * L_out, C_in * K)              # uint8

    if int8_path:
        # Shift activations by 128 so they fit int8; the shift is folded into the bias.
        patches = (patches.astype(jnp.int16) - 128).astype(jnp.int8)
        c = 128
    else:
        c = 0

    w_mat = w_q.reshape(C_out, C_in * K).T                      # (C_in*K, C_out) int8
    colsum = jnp.sum(w_mat.astype(jnp.int32), axis=0).astype(jnp.float32)

    # Fused requant constants: q = round(acc*scale + b2) + out_zp.
    scale = float(x_scale) * float(w_scale) / float(out_scale)
    b2 = (bias.astype(jnp.float32)
          + float(x_scale) * float(w_scale) * float(c - x_zp) * colsum) / float(out_scale)

    M, Kdim = patches.shape
    tm = min(tm_max, _round_up(M, 32))          # 32: 8-bit sublane tile
    tn = min(tn_max, _round_up(C_out, 128))     # lane-dense output stores
    Mp = _round_up(M, tm)
    Np = _round_up(C_out, tn)
    Kp = _round_up(Kdim, 32)                    # NOT 128 -- keep contraction compact

    # Padded K columns pair with zero weight rows -> contribute nothing; padded
    # M rows / N cols are sliced off after the kernel.
    patches_p = jnp.pad(patches, ((0, Mp - M), (0, Kp - Kdim)))
    w_p = jnp.pad(w_mat, ((0, Kp - Kdim), (0, Np - C_out)))
    b_p = jnp.pad(b2[None, :], ((0, 0), (0, Np - C_out)))

    kernel = functools.partial(_conv1d_q_kernel, scale=scale,
                               out_zp=float(out_zp), int8_path=int8_path)

    # Grid: C_out tiles outer, M tiles inner -> weight/bias blocks (index depends
    # only on j) stay resident in VMEM across consecutive M tiles.
    grid = (Np // tn, Mp // tm)

    out = pl.pallas_call(
        kernel,
        out_shape=jax.ShapeDtypeStruct((Mp, Np), jnp.uint8),
        grid=grid,
        in_specs=[pl.BlockSpec((tm, Kp), lambda j, i: (i, 0)),
                  pl.BlockSpec((Kp, tn), lambda j, i: (0, j)),
                  pl.BlockSpec((1, tn), lambda j, i: (0, j))],
        out_specs=pl.BlockSpec((tm, tn), lambda j, i: (i, j)),
        compiler_params=pltpu.CompilerParams(
            dimension_semantics=("parallel", "parallel"),
            vmem_limit_bytes=32 * 1024 * 1024),
        cost_estimate=pl.CostEstimate(
            flops=2 * M * Kdim * C_out,
            transcendentals=0,
            bytes_accessed=Mp * Kp + Kp * Np + 4 * Np + Mp * Np),
    )(patches_p, w_p, b_p)

    out = out[:M, :C_out]                                   # quint8 values
    out = out.reshape(N, L_out, C_out).transpose(0, 2, 1)   # back to NCL
    return out


if __name__ == "__main__":
    key = jax.random.PRNGKey(0)
    k1, k2, k3 = jax.random.split(key, 3)

    # Small shapes consistent with the module's forward (N, C, L).
    N, C_in, L = 2, 4, 16
    C_out, K = 8, 3
    stride, padding, dilation = 2, 1, 1

    # Deterministic synthetic quantized params:
    #   weight: (out_channels, in_channels // groups, kernel_size) qint8, zero_point=0
    #   bias  : (out_channels,) float
    x_q = jax.random.randint(k1, (N, C_in, L), 0, 256, dtype=jnp.int32).astype(jnp.uint8)
    w_q = jax.random.randint(k2, (C_out, C_in, K), -128, 128, dtype=jnp.int32).astype(jnp.int8)
    bias = (jax.random.normal(k3, (C_out,), jnp.float32) * 0.1)

    x_scale, x_zp = 0.05, 128        # input quint8 qparams
    w_scale = 0.02                   # weight qint8 scale (zero_point = 0)
    out_scale, out_zp = 0.1, 64      # module's self.scale / self.zero_point

    out = quantized_conv1d(x_q, x_scale, x_zp, w_q, w_scale, bias,
                           out_scale, out_zp,
                           stride=stride, padding=padding, dilation=dilation)
    out = jax.block_until_ready(out)

    # Pure-JAX reference (dequant -> float conv1d -> requant).
    x_f = (x_q.astype(jnp.float32) - x_zp) * x_scale
    w_f = w_q.astype(jnp.float32) * w_scale
    y = jax.lax.conv_general_dilated(
        x_f, w_f, window_strides=(stride,), padding=[(padding, padding)],
        rhs_dilation=(dilation,), dimension_numbers=("NCH", "OIH", "NCH"))
    y = y + bias[None, :, None]
    ref = jnp.clip(jnp.round(y / out_scale) + out_zp, 0, 255).astype(jnp.uint8)

    assert out.shape == ref.shape, (out.shape, ref.shape)
    max_err = jnp.max(jnp.abs(out.astype(jnp.int32) - ref.astype(jnp.int32)))
    assert int(max_err) <= 1, f"max quantized error {int(max_err)}"
    print("KERNEL_OK")
</pallas_src>

<mosaic_0001>
module attributes {stable_mosaic.version = 11 : i64} {
  func.func @_conv1d_q_kernel(%arg0: i32, %arg1: i32, %arg2: memref<32x32xi8, #tpu.memory_space<vmem>>, %arg3: memref<32x128xi8, #tpu.memory_space<vmem>>, %arg4: memref<1x128xf32, #tpu.memory_space<vmem>>, %arg5: memref<32x128xi8, #tpu.memory_space<vmem>>) attributes {dimension_semantics = [#tpu.dimension_semantics<parallel>, #tpu.dimension_semantics<parallel>], iteration_bounds = array<i64: 1, 1>, scalar_prefetch = 0 : i64, scratch_operands = 0 : i64, tpu.core_type = #tpu.core_type<tc>, window_params = [{transform_indices = @transform_0, window_bounds = array<i64: 32, 32>}, {transform_indices = @transform_1, window_bounds = array<i64: 32, 128>}, {transform_indices = @transform_2, window_bounds = array<i64: 1, 128>}, {transform_indices = @transform_3, window_bounds = array<i64: 32, 128>}]} {
    %c0 = arith.constant 0 : index
    %c0_0 = arith.constant 0 : index
    %0 = vector.load %arg2[%c0, %c0_0] : memref<32x32xi8, #tpu.memory_space<vmem>>, vector<32x32xi8>
    %1 = arith.uitofp %0 : vector<32x32xi8> to vector<32x32xbf16>
    %c0_1 = arith.constant 0 : index
    %c0_2 = arith.constant 0 : index
    %2 = vector.load %arg3[%c0_1, %c0_2] : memref<32x128xi8, #tpu.memory_space<vmem>>, vector<32x128xi8>
    %3 = arith.sitofp %2 : vector<32x128xi8> to vector<32x128xbf16>
    %cst = arith.constant dense<0.000000e+00> : vector<32x128xf32>
    %4 = tpu.matmul %1, %3, %cst {dimension_numbers = #tpu.dot_dimension_numbers<[1], [0], [0], [1], [0, 0, 1, 1], [], []>} : vector<32x32xbf16>, vector<32x128xbf16>, vector<32x128xf32> -> vector<32x128xf32>
    %cst_3 = arith.constant 0.00999999977 : f32
    %5 = vector.broadcast %cst_3 : f32 to vector<32x128xf32>
    %6 = arith.mulf %4, %5 : vector<32x128xf32>
    %c0_4 = arith.constant 0 : index
    %c0_5 = arith.constant 0 : index
    %7 = vector.load %arg4[%c0_4, %c0_5] : memref<1x128xf32, #tpu.memory_space<vmem>>, vector<1x128xf32>
    %8 = vector.broadcast %7 : vector<1x128xf32> to vector<32x128xf32>
    %9 = arith.addf %6, %8 : vector<32x128xf32>
    %10 = math.roundeven %9 : vector<32x128xf32>
    %cst_6 = arith.constant 6.400000e+01 : f32
    %11 = vector.broadcast %cst_6 : f32 to vector<32x128xf32>
    %12 = arith.addf %10, %11 : vector<32x128xf32>
    %cst_7 = arith.constant 0.000000e+00 : f32
    %cst_8 = arith.constant 2.550000e+02 : f32
    %13 = vector.broadcast %cst_7 : f32 to vector<32x128xf32>
    %14 = arith.maximumf %13, %12 : vector<32x128xf32>
    %15 = vector.broadcast %cst_8 : f32 to vector<32x128xf32>
    %16 = arith.minimumf %15, %14 : vector<32x128xf32>
    %17 = arith.fptoui %16 : vector<32x128xf32> to vector<32x128xi8>
    %c0_9 = arith.constant 0 : index
    %c0_10 = arith.constant 0 : index
    %18 = vector.load %arg5[%c0_9, %c0_10] : memref<32x128xi8, #tpu.memory_space<vmem>>, vector<32x128xi8>
    tpu.vector_store %arg5[%c0_9, %c0_10], %17 {strides = array<i32>} : memref<32x128xi8, #tpu.memory_space<vmem>>, vector<32x128xi8>,
    return
  }
  func.func @transform_0(%arg0: i32, %arg1: i32) -> (i32, i32) {
    %c0_i32 = arith.constant 0 : i32
    %c0_i32_0 = arith.constant 0 : i32
    return %arg1, %c0_i32 : i32, i32
  }
  func.func @transform_1(%arg0: i32, %arg1: i32) -> (i32, i32) {
    %c0_i32 = arith.constant 0 : i32
    %c0_i32_0 = arith.constant 0 : i32
    return %c0_i32, %arg0 : i32, i32
  }
  func.func @transform_2(%arg0: i32, %arg1: i32) -> (i32, i32) {
    %c0_i32 = arith.constant 0 : i32
    %c0_i32_0 = arith.constant 0 : i32
    return %c0_i32, %arg0 : i32, i32
  }
  func.func @transform_3(%arg0: i32, %arg1: i32) -> (i32, i32) {
    %c0_i32 = arith.constant 0 : i32
    return %arg1, %arg0 : i32, i32
  }
}

</mosaic_0001>

<bundles_post_ra>
// kernel: tpu_custom_call.1
= control target key start
LH: loop header
LB: loop body
LE: loop exit
PB: predicated region body
PF: predicated region fallthrough
CT: control target
= control target key end

     0   :  { %8 = vsyncpa [#allocation3], 0  ;;  %s328_s0 = inlined_call_operand.hbm [shape: u8[32,32], index: 0, kind: input, shape index: {}]   ;;  %s329_s1 = inlined_call_operand.hbm [shape: s8[32,128], index: 1, kind: input, shape index: {}]   ;;  %s330_s2 = inlined_call_operand.vmem [shape: f32[1,128], index: 2, kind: input, shape index: {}]   ;;  %s331_s3 = inlined_call_operand.hbm [shape: u8[32,128], index: 3, kind: output, shape index: {}]  }
   0x1   :  { %9 = vsyncpa [#allocation6], 0 }
   0x2   :  { %10 = vsyncpa [#allocation4], 0  ;;  %s293_s12 = smov [#allocation2]   ;;  %s294_s14 = smov [#allocation5]  }
   0x3   :  { %s17_s13 = sshll.u32 %s293_s12, 4  ;;  %s27_s15 = sshll.u32 %s294_s14, 4  ;;  %s18_s13 = int_to_ptr.vmem [resolvable:$true] %s17_s13  ;;  %s28_s15 = int_to_ptr.vmem [resolvable:$true] %s27_s15 }
   0x4   :  { %s235_s16 = scalar_lea.vmem %s18_s13, 128  ;;  %p240_p1 = scmp.lt.s32.totalorder %s18_s13, %s18_s13 }
   0x5   :  { %p236_p0 = scmp.ne.s32.totalorder %s18_s13, %s235_s16  ;;  %p241_p2 = scmp.lt.s32.totalorder %s235_s16, %s235_s16 }
   0x7   :  { %p242_p3 = por %p241_p2, %p240_p1 }
   0x9   :  { %p243_p4 = pnand %p242_p3, %p236_p0 }
   0xb   :  { %246 = shalt.err (!%p243_p4)
}
   0xc   :  { %20 = dma.hbm_to_vmem [thread:$0]  %s328_s0, 128, %s18_s13, [#allocation3]  }
   0xd   :  { %s255_s19 = scalar_lea.vmem %s28_s15, 128  ;;  %p260_p6 = scmp.lt.s32.totalorder %s28_s15, %s28_s15 }
   0xe   :  { %p256_p5 = scmp.ne.s32.totalorder %s28_s15, %s255_s19  ;;  %p261_p7 = scmp.lt.s32.totalorder %s255_s19, %s255_s19 }
  0x10   :  { %p262_p8 = por %p261_p7, %p260_p6 }
  0x12   :  { %p263_p9 = pnand %p262_p8, %p256_p5 }
  0x14   :  { %266 = shalt.err (!%p263_p9)
}
  0x15   :  { %30 = dma.hbm_to_vmem [thread:$0]  %s329_s1, 128, %s28_s15, [#allocation6]  }
  0x16   :  { %287 = dma.done.wait [#allocation3], 128  }
  0x17   :  { %288 = vsyncadd [#allocation3], 4294967168 }
  0x18   :  { %289 = dma.done.wait [#allocation6], 128  }
  0x19   :  { %290 = vsyncadd [#allocation6], 4294967168  ;;  %v43_v0 = vld [vmem:[#allocation5] sm:$0xff]  ;;  %v40_v1 = vld [vmem:[#allocation2] sm:$0xff]  ;;  %vm46_vm0 = vcmask 261120  }
  0x1a   :  { %v44_v2 = vunpack.c.l.s8.bf16 %v43_v0  ;;  %v45_v3 = vunpack.c.h.s8.bf16 %v43_v0  ;;  %v41_v4 = vunpack.c.l.u8.bf16 %v40_v1  ;;  %v42_v5 = vunpack.c.h.u8.bf16 %v40_v1  ;;  %v167_v7 = vld [vmem:[%s330_s2] ss:$0 sm:$0xff]  ;;  %s295_s2 = smov [#allocation7]  }
  0x1b   :  { %s155_s22 = sshll.u32 %s295_s2, 4  ;;  %s156_s22 = int_to_ptr.vmem [resolvable:$true] %s155_s22 }
  0x1c   :  { %176 = vmatprep.subr.bf16.mxu0 %v45_v3  ;;  %180 = vmatprep.mubr.msk.bf16.mxu0 %vm46_vm0, %v41_v4  ;;  %s267_s23 = scalar_lea.vmem %s156_s22, 128  ;;  %p272_p11 = scmp.lt.s32.totalorder %s156_s22, %s156_s22 }
  0x1d   :  { %177 = vmatpush3.bf16.msra.mxu0 %v45_v3  ;;  %p268_p10 = scmp.ne.s32.totalorder %s156_s22, %s267_s23  ;;  %p273_p12 = scmp.lt.s32.totalorder %s267_s23, %s267_s23 }
  0x1e   :  { %178 = vmatprep.subr.bf16.mxu0 %v44_v2 }
  0x1f   :  { %p274_p13 = por %p273_p12, %p272_p11 }
  0x21   :  { %179 = vmatpush3.bf16.msra.mxu0 %v44_v2  ;;  %p275_p0 = pnand %p274_p13, %p268_p10 }
  0x24   :  { %181 = vmatmul.mubr.msk.bf16.vlgmr.msra.gmra.mxu0 %vm46_vm0, %v42_v5 }
  0xe4   :  { %v182_v6 = vpop.f32.mrf.mxu0 }
  0xe5   :  { %v104_v8 = vmul.f32 0.01, %v182_v6 }
  0xe6   :  { %v87_v9 = vpop.f32.mrf.mxu0 }
  0xe7   :  { %v115_v10 = vadd.f32 %v167_v7, %v104_v8  ;;  %v102_v11 = vmul.f32 0.01, %v87_v9 }
  0xe8   :  { %v183_v12 = vpop.f32.mrf.mxu0 }
  0xe9   :  { %v202_v13 = vcvt.f32.s32 %v115_v10  ;;  %v113_v14 = vadd.f32 %v167_v7, %v102_v11  ;;  %v105_v15 = vmul.f32 0.01, %v183_v12  ;;  %v200_v19 = vand.u32 2147483647, %v115_v10 }
  0xea   :  { %v90_v16 = vpop.f32.mrf.mxu0  ;;  %v205_v23 = vand.u32 2147483648, %v115_v10 }
  0xeb   :  { %v203_v17 = vcvt.s32.f32 %v202_v13  ;;  %v186_v18 = vcvt.f32.s32 %v113_v14  ;;  %v116_v20 = vadd.f32 %v167_v7, %v105_v15  ;;  %v103_v21 = vmul.f32 0.01, %v90_v16 }
  0xec   :  { %v184_v25 = vand.u32 2147483647, %v113_v14  ;;  %v189_v30 = vand.u32 2147483648, %v113_v14  ;;  %vm201_vm1 = vcmp.lt.f32.partialorder %v200_v19, 8388608.0 }
  0xed   :  { %v204_v22 = vand.u32 2147483647, %v203_v17  ;;  %v187_v24 = vcvt.s32.f32 %v186_v18  ;;  %v210_v26 = vcvt.f32.s32 %v116_v20  ;;  %v114_v27 = vadd.f32 %v167_v7, %v103_v21 }
  0xee   :  { %v208_v34 = vand.u32 2147483647, %v116_v20  ;;  %vm185_vm2 = vcmp.lt.f32.partialorder %v184_v25, 8388608.0  ;;  %v213_v37 = vand.u32 2147483648, %v116_v20 }
  0xef   :  { %v206_v28 = vor.u32 %v205_v23, %v204_v22  ;;  %v188_v29 = vand.u32 2147483647, %v187_v24  ;;  %v211_v31 = vcvt.s32.f32 %v210_v26  ;;  %v194_v32 = vcvt.f32.s32 %v114_v27 }
  0xf0   :  { %v192_v39 = vand.u32 2147483647, %v114_v27  ;;  %v197_v44 = vand.u32 2147483648, %v114_v27  ;;  %vm209_vm3 = vcmp.lt.f32.partialorder %v208_v34, 8388608.0 }
  0xf1   :  { %v190_v33 = vor.u32 %v189_v30, %v188_v29  ;;  %v207_v35 = vsel %vm201_vm1, %v206_v28, %v115_v10  ;;  %v212_v36 = vand.u32 2147483647, %v211_v31  ;;  %v195_v38 = vcvt.s32.f32 %v194_v32 }
  0xf2   :  { %v123_v41 = vadd.f32 64.0, %v207_v35  ;;  %vm193_vm4 = vcmp.lt.f32.partialorder %v192_v39, 8388608.0 }
  0xf3   :  { %v191_v40 = vsel %vm185_vm2, %v190_v33, %v113_v14  ;;  %v214_v42 = vor.u32 %v213_v37, %v212_v36  ;;  %v196_v43 = vand.u32 2147483647, %v195_v38 }
  0xf4   :  { %v121_v45 = vadd.f32 64.0, %v191_v40  ;;  %v170_v50 = vclamp-gez-f32 %v123_v41, 255.0 }
  0xf5   :  { %v198_v46 = vor.u32 %v197_v44, %v196_v43  ;;  %v215_v47 = vsel %vm209_vm3, %v214_v42, %v116_v20 }
  0xf6   :  { %v124_v48 = vadd.f32 64.0, %v215_v47  ;;  %v168_v49 = vclamp-gez-f32 %v121_v45, 255.0  ;;  %v220_v56 = vtrunc.f32 %v170_v50 }
  0xf7   :  { %v199_v51 = vsel %vm193_vm4, %v198_v46, %v114_v27 }
  0xf8   :  { %v122_v52 = vadd.f32 64.0, %v199_v51  ;;  %v171_v53 = vclamp-gez-f32 %v124_v48, 255.0  ;;  %v216_v55 = vtrunc.f32 %v168_v49  ;;  %v221_v62 = vcvt.f32.s32 %v220_v56 }
  0xfa   :  { %v169_v54 = vclamp-gez-f32 %v122_v52, 255.0  ;;  %v222_v57 = vtrunc.f32 %v171_v53  ;;  %v217_v60 = vcvt.f32.s32 %v216_v55 }
  0xfc   :  { %v218_v58 = vtrunc.f32 %v169_v54  ;;  %v223_v59 = vcvt.f32.s32 %v222_v57 }
  0xfe   :  { %v219_v61 = vcvt.f32.s32 %v218_v58  ;;  %v146_v0 = vpack.c.b16 %v223_v59, %v221_v62 }
 0x100   :  { %v145_v63 = vpack.c.b16 %v219_v61, %v217_v60 }
 0x102   :  { %v147_v1 = vpack.c.b8 %v146_v0, %v145_v63 }
 0x104   :  { %148 = vst [vmem:[#allocation7] sm:$0xff] %v147_v1 }
 0x105   :  { %278 = shalt.err (!%p275_p0)
}
 0x106   :  { %158 = dma.vmem_to_hbm [thread:$0]  %s156_s22, 128, %s331_s3, [#allocation4]  }
 0x107   :  { %291 = dma.done.wait [#allocation4], 128  }
 0x108   :  { %292 = vsyncadd [#allocation4], 4294967168 }
 0x109   :  { %162 = vsyncpa [#allocation3], 1 }
 0x10a   :  { %163 = vsyncpa [#allocation6], 1 }
 0x10b   :  { %164 = vsyncpa [#allocation4], 1 }

</bundles_post_ra>
